<compile_context>
chip_gen: v7x
topology: tpu7x:2x2x1
jax: 0.10.0
libtpu: 0.0.40
codegen_flags: <defaults>
</compile_context>

<pallas_src>
import jax
import jax.numpy as jnp
from jax.experimental import pallas as pl
from jax.experimental.pallas import tpu as pltpu


# ----------------------------------------------------------------------------
# Fused kernel: conv1 + ReLU + tail2 + AdaptiveAvgPool((1,1,3))
# ----------------------------------------------------------------------------
def _make_kernel(C1, NC, HW):
    """C1 = conv1 out-channels (16), NC = n_classes, HW = H*W (one D-plane)."""

    def kernel(xT_ref, w1T_ref, b1_ref, mb_ref, w2g_ref, b2_ref, inv_ref,
               o_ref, acc_ref):
        # xT_ref  : (1, 27*Cin, TILE) bf16   im2col tile (TILE = TD * H * W)
        # w1T_ref : (C1, 27*Cin)      bf16
        # b1_ref  : (C1, 1)           f32
        # mb_ref  : (TILE, 27)        bf16   0/1 base mask, constant block
        # w2g_ref : (9, NC, 3*C1)     f32    tail weights, (kh,kw) groups
        # b2_ref  : (NC, 1)           f32
        # inv_ref : (1, 3)            f32    1 / pool-window counts
        # o_ref   : (1, NC, 3)        f32
        # acc_ref : (2, C1, 27)       f32    [0]=running tap sums, [1]=d==0 plane
        t = pl.program_id(1)
        nt = pl.num_programs(1)

        @pl.when(t == 0)
        def _init():
            acc_ref[...] = jnp.zeros(acc_ref.shape, acc_ref.dtype)

        # conv1 + bias + ReLU : one MXU matmul (K = 27*Cin), voxels on lanes.
        y1 = jnp.dot(w1T_ref[...], xT_ref[0],
                     preferred_element_type=jnp.float32)            # (C1, TILE)
        y1 = jnp.maximum(y1 + b1_ref[...], 0.0)
        y1b = y1.astype(jnp.bfloat16)

        # Un-normalised tail-conv pool sums for the 9 in-plane taps x 3 W-bins.
        mb = mb_ref[...]                                            # (TILE, 27)
        qall = jnp.dot(y1b, mb, preferred_element_type=jnp.float32)  # (C1, 27)
        acc_ref[0] = acc_ref[0] + qall

        # d == 0 plane sums (needed to exclude it for the depth tap kd = 2).
        @pl.when(t == 0)
        def _first_plane():
            acc_ref[1] = jnp.dot(y1b[:, :HW], mb[:HW],
                                 preferred_element_type=jnp.float32)

        @pl.when(t == nt - 1)
        def _finalize():
            # d == D-1 plane sums (excluded for the depth tap kd = 0).
            q_last = jnp.dot(y1b[:, -HW:], mb[:HW],
                             preferred_element_type=jnp.float32)     # (C1, 27)
            s_all = acc_ref[0]
            # Stack the 3 depth-tap variants into the contraction dim (3*C1).
            tstack = jnp.concatenate(
                [s_all - q_last,          # kd = 0 : exclude d == D-1 sources
                 s_all,                   # kd = 1 : all sources
                 s_all - acc_ref[1]],     # kd = 2 : exclude d == 0 sources
                axis=0)                                              # (3*C1, 27)
            part = jnp.zeros((NC, 3), jnp.float32)
            for g in range(9):            # 9 (kh,kw) groups, once per batch
                part = part + jnp.dot(w2g_ref[g], tstack[:, 3 * g:3 * g + 3],
                                      preferred_element_type=jnp.float32)
            o_ref[0] = (part * inv_ref[...] + b2_ref[...]).astype(o_ref.dtype)

    return kernel


# ----------------------------------------------------------------------------
# Host-side layout plumbing (pure JAX)
# ----------------------------------------------------------------------------
def _im2col_channels_major(x_ncdhw):
    """(B, C, D, H, W) -> (B, 27*C, D*H*W); rows tap-major, channel minor."""
    B, C, D, H, W = x_ncdhw.shape
    xp = jnp.pad(x_ncdhw, ((0, 0), (0, 0), (1, 1), (1, 1), (1, 1)))
    cols = []
    for kd in range(3):
        for kh in range(3):
            for kw in range(3):
                cols.append(xp[:, :, kd:kd + D, kh:kh + H, kw:kw + W]
                            .reshape(B, C, D * H * W))
    return jnp.concatenate(cols, axis=1)


def _pool_base_matrix(td, H, W, out_w=3, dtype=jnp.bfloat16):
    """(td*H*W, 27) exact 0/1 mask.  Column (kh*3+kw)*3+j says whether the
    voxel at local (d_local, h, w) contributes, through in-plane tap (kh, kw),
    to pooling bin j.  Depth taps and 1/count normalisation handled in-kernel."""
    w_idx = jnp.arange(W)
    cols = []
    for kh in range(3):
        hm = jnp.ones((H,), jnp.float32)
        if kh == 0:
            hm = hm.at[H - 1].set(0.0)
        elif kh == 2:
            hm = hm.at[0].set(0.0)
        for kw in range(3):
            for j in range(out_w):
                s = (j * W) // out_w
                e = -((-(j + 1) * W) // out_w)      # ceil((j+1)*W/out_w)
                wsrc = w_idx - (kw - 1)
                wm = ((wsrc >= s) & (wsrc < e)).astype(jnp.float32)
                cols.append((hm[:, None] * wm[None, :]).reshape(H * W))
    base_hw = jnp.stack(cols, axis=-1)               # (H*W, 27)
    return jnp.tile(base_hw, (td, 1)).astype(dtype)  # (td*H*W, 27)


def _pool_inv_counts(D, H, W, out_w=3):
    inv = []
    for j in range(out_w):
        s = (j * W) // out_w
        e = -((-(j + 1) * W) // out_w)
        inv.append(1.0 / float(D * H * (e - s)))
    return jnp.asarray(inv, jnp.float32).reshape(1, out_w)


def _vmem_capacity_bytes():
    cap = 64 * 2 ** 20                        # conservative default (v7x)
    try:
        info = pltpu.get_tpu_info()
        cap = int(getattr(info, "vmem_capacity_bytes", cap)) or cap
    except Exception:
        pass
    return cap


def _choose_tile(D, HW, K1, C1, vmem_cap, tile_cap_voxels=None):
    """Pick a whole-D-plane tile (TILE = TD*H*W) sized from the VMEM budget."""
    DHW = D * HW
    # bytes per tile voxel: dbl-buffered bf16 x + bf16 mask + f32/bf16 y1 + slack
    per_voxel = 4 * K1 + 4 * 27 + 6 * C1 + 64
    cap = tile_cap_voxels
    if cap is None:
        cap = max(HW, int((0.45 * vmem_cap) // per_voxel))
    if DHW <= cap:
        return DHW, 1
    for td in range(D, 0, -1):
        tile = td * HW
        if D % td == 0 and tile <= cap and tile % 128 == 0:
            return tile, D // td
    # TODO(synk): pad W so a 128-aligned D-tile always exists instead of
    # falling back to the whole volume for awkward H*W factorisations.
    return DHW, 1


def init_params(key, n_channels, n_classes):
    """nn.Conv3d default init (uniform +/- 1/sqrt(fan_in)), DHWIO weight layout."""
    k1, k2, k3, k4 = jax.random.split(key, 4)

    def conv_init(kw, kb, cin, cout):
        fan_in = cin * 27
        bound = 1.0 / jnp.sqrt(jnp.float32(fan_in))
        w_pt = jax.random.uniform(kw, (cout, cin, 3, 3, 3), jnp.float32, -bound, bound)
        w = jnp.transpose(w_pt, (2, 3, 4, 1, 0))       # (kD,kH,kW,Cin,Cout)
        b = jax.random.uniform(kb, (cout,), jnp.float32, -bound, bound)
        return w, b

    w1, b1 = conv_init(k1, k2, n_channels, 16)
    w2, b2 = conv_init(k3, k4, 16, n_classes)
    return {"w1": w1, "b1": b1, "w2": w2, "b2": b2}


def my3d_forward(x_ncdhw, params, *, tile_cap_voxels=None):
    """Pallas implementation of My3DDepthwiseSeparableNet.forward.

    x_ncdhw: (B, Cin, D, H, W) float32  ->  (B, n_classes, 1, 3) float32
    """
    w1, b1, w2, b2 = params["w1"], params["b1"], params["w2"], params["b2"]
    B, Cin, D, H, W = x_ncdhw.shape
    C1 = w1.shape[-1]                 # 16
    NC = w2.shape[-1]                 # n_classes
    HW = H * W
    DHW = D * HW
    K1 = 27 * Cin

    vmem_cap = _vmem_capacity_bytes()
    TILE, NT = _choose_tile(D, HW, K1, C1, vmem_cap, tile_cap_voxels)
    TD = TILE // HW

    # Streamed operands in bf16 (f32 MXU accumulation inside the kernel).
    # TODO(synk): build the 27-tap im2col in-kernel from a halo'd raw slab
    # (memory_space=pl.ANY + make_async_copy) to avoid the 27x inflated stream.
    x_cols = _im2col_channels_major(x_ncdhw.astype(jnp.bfloat16))    # (B,K1,DHW)
    w1t = w1.reshape(K1, C1).T.astype(jnp.bfloat16)                  # (C1, K1)
    b1c = b1.reshape(C1, 1).astype(jnp.float32)
    # tail weights: (kd,kh,kw,c,o) -> (kh,kw, o, kd, c) -> (9, NC, 3*C1)
    w2g = jnp.transpose(w2, (1, 2, 4, 0, 3)).reshape(9, NC, 3 * C1).astype(jnp.float32)
    b2c = b2.reshape(NC, 1).astype(jnp.float32)
    mbase = _pool_base_matrix(TD, H, W)                              # (TILE, 27)
    inv_cnt = _pool_inv_counts(D, H, W)                              # (1, 3)

    fixed = (K1 * C1 + 27 * NC * C1 + C1 + NC + 3) * 8
    est = TILE * (4 * K1 + 4 * 27 + 6 * C1 + 64) + fixed + (1 << 20)
    vmem_limit = int(max(min(max(2 * est, 24 * 2 ** 20),
                             int(0.75 * vmem_cap)),
                         est + (2 << 20)))

    kernel = _make_kernel(C1, NC, HW)

    pooled = pl.pallas_call(
        kernel,
        out_shape=jax.ShapeDtypeStruct((B, NC, 3), jnp.float32),
        grid=(B, NT),
        in_specs=[
            pl.BlockSpec((1, K1, TILE), lambda b, t: (b, 0, t)),      # x im2col
            pl.BlockSpec((C1, K1), lambda b, t: (0, 0)),              # w1^T
            pl.BlockSpec((C1, 1), lambda b, t: (0, 0)),               # b1
            pl.BlockSpec((TILE, 27), lambda b, t: (0, 0)),            # base mask
            pl.BlockSpec((9, NC, 3 * C1), lambda b, t: (0, 0, 0)),    # tail w
            pl.BlockSpec((NC, 1), lambda b, t: (0, 0)),               # b2
            pl.BlockSpec((1, 3), lambda b, t: (0, 0)),                # 1/count
        ],
        out_specs=pl.BlockSpec((1, NC, 3), lambda b, t: (b, 0, 0)),
        scratch_shapes=[pltpu.VMEM((2, C1, 27), jnp.float32)],
        compiler_params=pltpu.CompilerParams(
            dimension_semantics=("parallel", "arbitrary"),
            vmem_limit_bytes=vmem_limit,
        ),
    )(x_cols, w1t, b1c, mbase, w2g, b2c, inv_cnt)                    # (B, NC, 3)

    return pooled.reshape(B, NC, 1, 3)


# ----------------------------------------------------------------------------
# Pure-JAX reference (correctness check)
# ----------------------------------------------------------------------------
def reference_forward(x_ncdhw, params):
    w1, b1, w2, b2 = params["w1"], params["b1"], params["w2"], params["b2"]
    x = jnp.transpose(x_ncdhw, (0, 2, 3, 4, 1)).astype(jnp.float32)
    dn = jax.lax.conv_dimension_numbers(x.shape, w1.shape, ("NDHWC", "DHWIO", "NDHWC"))
    y = jax.lax.conv_general_dilated(x, w1, (1, 1, 1), "SAME", dimension_numbers=dn) + b1
    y = jnp.maximum(y, 0.0)
    dn2 = jax.lax.conv_dimension_numbers(y.shape, w2.shape, ("NDHWC", "DHWIO", "NDHWC"))
    y = jax.lax.conv_general_dilated(y, w2, (1, 1, 1), "SAME", dimension_numbers=dn2) + b2
    B, D, H, W, NC = y.shape
    cols = []
    for j in range(3):
        s = (j * W) // 3
        e = -((-(j + 1) * W) // 3)
        cols.append(jnp.mean(y[:, :, :, s:e, :], axis=(1, 2, 3)))     # (B, NC)
    return jnp.stack(cols, axis=-1).reshape(B, NC, 1, 3)


if __name__ == "__main__":
    key = jax.random.PRNGKey(0)
    kx, kp = jax.random.split(key)

    B, Cin, D, H, W = 2, 4, 8, 8, 8
    n_classes = 10

    x = jax.random.normal(kx, (B, Cin, D, H, W), jnp.float32)         # NCDHW
    params = init_params(kp, Cin, n_classes)

    ref = reference_forward(x, params)

    # Default path (whole volume fits in one tile).
    out = jax.jit(my3d_forward)(x, params)
    out = jax.block_until_ready(out)
    assert out.shape == (B, n_classes, 1, 3), out.shape
    err = float(jnp.max(jnp.abs(out - ref)))
    assert jnp.allclose(out, ref, rtol=2e-2, atol=2e-2), err

    # Forced multi-tile path (exercises the cross-D-tile accumulation).
    out_t = jax.jit(lambda a, p: my3d_forward(a, p, tile_cap_voxels=256))(x, params)
    out_t = jax.block_until_ready(out_t)
    err_t = float(jnp.max(jnp.abs(out_t - ref)))
    assert jnp.allclose(out_t, ref, rtol=2e-2, atol=2e-2), err_t

    print("KERNEL_OK")
</pallas_src>

<mosaic_0001>
module attributes {stable_mosaic.version = 11 : i64} {
  func.func @kernel(%arg0: i32, %arg1: i32, %arg2: memref<1x108x512xbf16, #tpu.memory_space<vmem>>, %arg3: memref<16x108xbf16, #tpu.memory_space<vmem>>, %arg4: memref<16x1xf32, #tpu.memory_space<vmem>>, %arg5: memref<512x27xbf16, #tpu.memory_space<vmem>>, %arg6: memref<9x10x48xf32, #tpu.memory_space<vmem>>, %arg7: memref<10x1xf32, #tpu.memory_space<vmem>>, %arg8: memref<1x3xf32, #tpu.memory_space<vmem>>, %arg9: memref<1x10x3xf32, #tpu.memory_space<vmem>>, %arg10: memref<2x16x27xf32, #tpu.memory_space<vmem>>) attributes {dimension_semantics = [#tpu.dimension_semantics<parallel>, #tpu.dimension_semantics<arbitrary>], iteration_bounds = array<i64: 2, 1>, scalar_prefetch = 0 : i64, scratch_operands = 1 : i64, tpu.core_type = #tpu.core_type<tc>, window_params = [{transform_indices = @transform_0, window_bounds = array<i64: 1, 108, 512>}, {pipeline_mode = #tpu.pipeline_mode<synchronous>, transform_indices = @transform_1, window_bounds = array<i64: 16, 108>}, {pipeline_mode = #tpu.pipeline_mode<synchronous>, transform_indices = @transform_2, window_bounds = array<i64: 16, 1>}, {pipeline_mode = #tpu.pipeline_mode<synchronous>, transform_indices = @transform_3, window_bounds = array<i64: 512, 27>}, {pipeline_mode = #tpu.pipeline_mode<synchronous>, transform_indices = @transform_4, window_bounds = array<i64: 9, 10, 48>}, {pipeline_mode = #tpu.pipeline_mode<synchronous>, transform_indices = @transform_5, window_bounds = array<i64: 10, 1>}, {pipeline_mode = #tpu.pipeline_mode<synchronous>, transform_indices = @transform_6, window_bounds = array<i64: 1, 3>}, {transform_indices = @transform_7, window_bounds = array<i64: 1, 10, 3>}]} {
    %c0_i32 = arith.constant 0 : i32
    %0 = arith.cmpi eq, %arg1, %c0_i32 : i32
    %1 = arith.extui %0 : i1 to i32
    %c0_i32_0 = arith.constant 0 : i32
    %2 = arith.cmpi ne, %1, %c0_i32_0 : i32
    scf.if %2 {
      %cst_21 = arith.constant 0.000000e+00 : f32
      %27 = vector.broadcast %cst_21 : f32 to vector<2x16x27xf32>
      %c0_22 = arith.constant 0 : index
      %c0_23 = arith.constant 0 : index
      %c0_24 = arith.constant 0 : index
      %28 = vector.load %arg10[%c0_22, %c0_23, %c0_24] : memref<2x16x27xf32, #tpu.memory_space<vmem>>, vector<2x16x27xf32>
      tpu.vector_store %arg10[%c0_22, %c0_23, %c0_24], %27 {strides = array<i32>} : memref<2x16x27xf32, #tpu.memory_space<vmem>>, vector<2x16x27xf32>,
    } else {
    }
    %c0 = arith.constant 0 : index
    %c0_1 = arith.constant 0 : index
    %3 = vector.load %arg3[%c0, %c0_1] : memref<16x108xbf16, #tpu.memory_space<vmem>>, vector<16x108xbf16>
    %c0_2 = arith.constant 0 : index
    %c0_3 = arith.constant 0 : index
    %c0_4 = arith.constant 0 : index
    %4 = vector.load %arg2[%c0_2, %c0_3, %c0_4] : memref<1x108x512xbf16, #tpu.memory_space<vmem>>, vector<1x108x512xbf16>
    %5 = vector.shape_cast %4 : vector<1x108x512xbf16> to vector<108x512xbf16>
    %cst = arith.constant dense<0.000000e+00> : vector<16x512xf32>
    %6 = tpu.matmul %3, %5, %cst {dimension_numbers = #tpu.dot_dimension_numbers<[1], [0], [0], [1], [0, 0, 1, 1], [], []>} : vector<16x108xbf16>, vector<108x512xbf16>, vector<16x512xf32> -> vector<16x512xf32>
    %c0_5 = arith.constant 0 : index
    %c0_6 = arith.constant 0 : index
    %7 = vector.load %arg4[%c0_5, %c0_6] : memref<16x1xf32, #tpu.memory_space<vmem>>, vector<16x1xf32>
    %8 = vector.broadcast %7 : vector<16x1xf32> to vector<16x512xf32>
    %9 = arith.addf %6, %8 : vector<16x512xf32>
    %cst_7 = arith.constant 0.000000e+00 : f32
    %10 = vector.broadcast %cst_7 : f32 to vector<16x512xf32>
    %11 = arith.maximumf %9, %10 : vector<16x512xf32>
    %12 = arith.truncf %11 : vector<16x512xf32> to vector<16x512xbf16>
    %c0_8 = arith.constant 0 : index
    %c0_9 = arith.constant 0 : index
    %13 = vector.load %arg5[%c0_8, %c0_9] : memref<512x27xbf16, #tpu.memory_space<vmem>>, vector<512x27xbf16>
    %cst_10 = arith.constant dense<0.000000e+00> : vector<16x27xf32>
    %14 = tpu.matmul %12, %13, %cst_10 {dimension_numbers = #tpu.dot_dimension_numbers<[1], [0], [0], [1], [0, 0, 1, 1], [], []>} : vector<16x512xbf16>, vector<512x27xbf16>, vector<16x27xf32> -> vector<16x27xf32>
    %c0_11 = arith.constant 0 : index
    %c0_12 = arith.constant 0 : index
    %c0_13 = arith.constant 0 : index
    %15 = vector.load %arg10[%c0_11, %c0_12, %c0_13] : memref<2x16x27xf32, #tpu.memory_space<vmem>>, vector<1x16x27xf32>
    %16 = vector.shape_cast %15 : vector<1x16x27xf32> to vector<16x27xf32>
    %17 = arith.addf %16, %14 : vector<16x27xf32>
    %c0_14 = arith.constant 0 : index
    %c0_15 = arith.constant 0 : index
    %c0_16 = arith.constant 0 : index
    %18 = vector.load %arg10[%c0_14, %c0_15, %c0_16] : memref<2x16x27xf32, #tpu.memory_space<vmem>>, vector<1x16x27xf32>
    %19 = vector.shape_cast %18 : vector<1x16x27xf32> to vector<16x27xf32>
    %20 = vector.shape_cast %17 : vector<16x27xf32> to vector<1x16x27xf32>
    tpu.vector_store %arg10[%c0_14, %c0_15, %c0_16], %20 {strides = array<i32>} : memref<2x16x27xf32, #tpu.memory_space<vmem>>, vector<1x16x27xf32>,
    %c0_i32_17 = arith.constant 0 : i32
    %21 = arith.cmpi eq, %arg1, %c0_i32_17 : i32
    %22 = arith.extui %21 : i1 to i32
    %c0_i32_18 = arith.constant 0 : i32
    %23 = arith.cmpi ne, %22, %c0_i32_18 : i32
    scf.if %23 {
      %27 = vector.extract_strided_slice %12 {offsets = [0, 0], sizes = [16, 64], strides = [1, 1]} : vector<16x512xbf16> to vector<16x64xbf16>
      %28 = vector.extract_strided_slice %13 {offsets = [0, 0], sizes = [64, 27], strides = [1, 1]} : vector<512x27xbf16> to vector<64x27xbf16>
      %cst_21 = arith.constant dense<0.000000e+00> : vector<16x27xf32>
      %29 = tpu.matmul %27, %28, %cst_21 {dimension_numbers = #tpu.dot_dimension_numbers<[1], [0], [0], [1], [0, 0, 1, 1], [], []>} : vector<16x64xbf16>, vector<64x27xbf16>, vector<16x27xf32> -> vector<16x27xf32>
      %c1 = arith.constant 1 : index
      %c0_22 = arith.constant 0 : index
      %c0_23 = arith.constant 0 : index
      %30 = vector.load %arg10[%c1, %c0_22, %c0_23] : memref<2x16x27xf32, #tpu.memory_space<vmem>>, vector<1x16x27xf32>
      %31 = vector.shape_cast %30 : vector<1x16x27xf32> to vector<16x27xf32>
      %32 = vector.shape_cast %29 : vector<16x27xf32> to vector<1x16x27xf32>
      tpu.vector_store %arg10[%c1, %c0_22, %c0_23], %32 {strides = array<i32>} : memref<2x16x27xf32, #tpu.memory_space<vmem>>, vector<1x16x27xf32>,
    } else {
    }
    %c0_i32_19 = arith.constant 0 : i32
    %24 = arith.cmpi eq, %arg1, %c0_i32_19 : i32
    %25 = arith.extui %24 : i1 to i32
    %c0_i32_20 = arith.constant 0 : i32
    %26 = arith.cmpi ne, %25, %c0_i32_20 : i32
    scf.if %26 {
      %27 = vector.extract_strided_slice %12 {offsets = [0, 448], sizes = [16, 64], strides = [1, 1]} : vector<16x512xbf16> to vector<16x64xbf16>
      %28 = vector.extract_strided_slice %13 {offsets = [0, 0], sizes = [64, 27], strides = [1, 1]} : vector<512x27xbf16> to vector<64x27xbf16>
      %cst_21 = arith.constant dense<0.000000e+00> : vector<16x27xf32>
      %29 = tpu.matmul %27, %28, %cst_21 {dimension_numbers = #tpu.dot_dimension_numbers<[1], [0], [0], [1], [0, 0, 1, 1], [], []>} : vector<16x64xbf16>, vector<64x27xbf16>, vector<16x27xf32> -> vector<16x27xf32>
      %c0_22 = arith.constant 0 : index
      %c0_23 = arith.constant 0 : index
      %c0_24 = arith.constant 0 : index
      %30 = vector.load %arg10[%c0_22, %c0_23, %c0_24] : memref<2x16x27xf32, #tpu.memory_space<vmem>>, vector<1x16x27xf32>
      %31 = vector.shape_cast %30 : vector<1x16x27xf32> to vector<16x27xf32>
      %32 = arith.subf %31, %29 : vector<16x27xf32>
      %c1 = arith.constant 1 : index
      %c0_25 = arith.constant 0 : index
      %c0_26 = arith.constant 0 : index
      %33 = vector.load %arg10[%c1, %c0_25, %c0_26] : memref<2x16x27xf32, #tpu.memory_space<vmem>>, vector<1x16x27xf32>
      %34 = vector.shape_cast %33 : vector<1x16x27xf32> to vector<16x27xf32>
      %35 = arith.subf %31, %34 : vector<16x27xf32>
      %36 = tpu.concatenate %32, %31, %35 in 0 : vector<16x27xf32>, vector<16x27xf32>, vector<16x27xf32> -> vector<48x27xf32>
      %cst_27 = arith.constant 0.000000e+00 : f32
      %37 = vector.broadcast %cst_27 : f32 to vector<10x3xf32>
      %c0_28 = arith.constant 0 : index
      %c0_29 = arith.constant 0 : index
      %c0_30 = arith.constant 0 : index
      %38 = vector.load %arg6[%c0_28, %c0_29, %c0_30] : memref<9x10x48xf32, #tpu.memory_space<vmem>>, vector<1x10x48xf32>
      %39 = vector.shape_cast %38 : vector<1x10x48xf32> to vector<10x48xf32>
      %40 = vector.extract_strided_slice %36 {offsets = [0, 0], sizes = [48, 3], strides = [1, 1]} : vector<48x27xf32> to vector<48x3xf32>
      %cst_31 = arith.constant dense<0.000000e+00> : vector<10x3xf32>
      %41 = tpu.matmul %39, %40, %cst_31 {dimension_numbers = #tpu.dot_dimension_numbers<[1], [0], [0], [1], [0, 0, 1, 1], [], []>} : vector<10x48xf32>, vector<48x3xf32>, vector<10x3xf32> -> vector<10x3xf32>
      %42 = arith.addf %37, %41 : vector<10x3xf32>
      %c1_32 = arith.constant 1 : index
      %c0_33 = arith.constant 0 : index
      %c0_34 = arith.constant 0 : index
      %43 = vector.load %arg6[%c1_32, %c0_33, %c0_34] : memref<9x10x48xf32, #tpu.memory_space<vmem>>, vector<1x10x48xf32>
      %44 = vector.shape_cast %43 : vector<1x10x48xf32> to vector<10x48xf32>
      %45 = vector.extract_strided_slice %36 {offsets = [0, 3], sizes = [48, 3], strides = [1, 1]} : vector<48x27xf32> to vector<48x3xf32>
      %cst_35 = arith.constant dense<0.000000e+00> : vector<10x3xf32>
      %46 = tpu.matmul %44, %45, %cst_35 {dimension_numbers = #tpu.dot_dimension_numbers<[1], [0], [0], [1], [0, 0, 1, 1], [], []>} : vector<10x48xf32>, vector<48x3xf32>, vector<10x3xf32> -> vector<10x3xf32>
      %47 = arith.addf %42, %46 : vector<10x3xf32>
      %c2 = arith.constant 2 : index
      %c0_36 = arith.constant 0 : index
      %c0_37 = arith.constant 0 : index
      %48 = vector.load %arg6[%c2, %c0_36, %c0_37] : memref<9x10x48xf32, #tpu.memory_space<vmem>>, vector<1x10x48xf32>
      %49 = vector.shape_cast %48 : vector<1x10x48xf32> to vector<10x48xf32>
      %50 = vector.extract_strided_slice %36 {offsets = [0, 6], sizes = [48, 3], strides = [1, 1]} : vector<48x27xf32> to vector<48x3xf32>
      %cst_38 = arith.constant dense<0.000000e+00> : vector<10x3xf32>
      %51 = tpu.matmul %49, %50, %cst_38 {dimension_numbers = #tpu.dot_dimension_numbers<[1], [0], [0], [1], [0, 0, 1, 1], [], []>} : vector<10x48xf32>, vector<48x3xf32>, vector<10x3xf32> -> vector<10x3xf32>
      %52 = arith.addf %47, %51 : vector<10x3xf32>
      %c3 = arith.constant 3 : index
      %c0_39 = arith.constant 0 : index
      %c0_40 = arith.constant 0 : index
      %53 = vector.load %arg6[%c3, %c0_39, %c0_40] : memref<9x10x48xf32, #tpu.memory_space<vmem>>, vector<1x10x48xf32>
      %54 = vector.shape_cast %53 : vector<1x10x48xf32> to vector<10x48xf32>
      %55 = vector.extract_strided_slice %36 {offsets = [0, 9], sizes = [48, 3], strides = [1, 1]} : vector<48x27xf32> to vector<48x3xf32>
      %cst_41 = arith.constant dense<0.000000e+00> : vector<10x3xf32>
      %56 = tpu.matmul %54, %55, %cst_41 {dimension_numbers = #tpu.dot_dimension_numbers<[1], [0], [0], [1], [0, 0, 1, 1], [], []>} : vector<10x48xf32>, vector<48x3xf32>, vector<10x3xf32> -> vector<10x3xf32>
      %57 = arith.addf %52, %56 : vector<10x3xf32>
      %c4 = arith.constant 4 : index
      %c0_42 = arith.constant 0 : index
      %c0_43 = arith.constant 0 : index
      %58 = vector.load %arg6[%c4, %c0_42, %c0_43] : memref<9x10x48xf32, #tpu.memory_space<vmem>>, vector<1x10x48xf32>
      %59 = vector.shape_cast %58 : vector<1x10x48xf32> to vector<10x48xf32>
      %60 = vector.extract_strided_slice %36 {offsets = [0, 12], sizes = [48, 3], strides = [1, 1]} : vector<48x27xf32> to vector<48x3xf32>
      %cst_44 = arith.constant dense<0.000000e+00> : vector<10x3xf32>
      %61 = tpu.matmul %59, %60, %cst_44 {dimension_numbers = #tpu.dot_dimension_numbers<[1], [0], [0], [1], [0, 0, 1, 1], [], []>} : vector<10x48xf32>, vector<48x3xf32>, vector<10x3xf32> -> vector<10x3xf32>
      %62 = arith.addf %57, %61 : vector<10x3xf32>
      %c5 = arith.constant 5 : index
      %c0_45 = arith.constant 0 : index
      %c0_46 = arith.constant 0 : index
      %63 = vector.load %arg6[%c5, %c0_45, %c0_46] : memref<9x10x48xf32, #tpu.memory_space<vmem>>, vector<1x10x48xf32>
      %64 = vector.shape_cast %63 : vector<1x10x48xf32> to vector<10x48xf32>
      %65 = vector.extract_strided_slice %36 {offsets = [0, 15], sizes = [48, 3], strides = [1, 1]} : vector<48x27xf32> to vector<48x3xf32>
      %cst_47 = arith.constant dense<0.000000e+00> : vector<10x3xf32>
      %66 = tpu.matmul %64, %65, %cst_47 {dimension_numbers = #tpu.dot_dimension_numbers<[1], [0], [0], [1], [0, 0, 1, 1], [], []>} : vector<10x48xf32>, vector<48x3xf32>, vector<10x3xf32> -> vector<10x3xf32>
      %67 = arith.addf %62, %66 : vector<10x3xf32>
      %c6 = arith.constant 6 : index
      %c0_48 = arith.constant 0 : index
      %c0_49 = arith.constant 0 : index
      %68 = vector.load %arg6[%c6, %c0_48, %c0_49] : memref<9x10x48xf32, #tpu.memory_space<vmem>>, vector<1x10x48xf32>
      %69 = vector.shape_cast %68 : vector<1x10x48xf32> to vector<10x48xf32>
      %70 = vector.extract_strided_slice %36 {offsets = [0, 18], sizes = [48, 3], strides = [1, 1]} : vector<48x27xf32> to vector<48x3xf32>
      %cst_50 = arith.constant dense<0.000000e+00> : vector<10x3xf32>
      %71 = tpu.matmul %69, %70, %cst_50 {dimension_numbers = #tpu.dot_dimension_numbers<[1], [0], [0], [1], [0, 0, 1, 1], [], []>} : vector<10x48xf32>, vector<48x3xf32>, vector<10x3xf32> -> vector<10x3xf32>
      %72 = arith.addf %67, %71 : vector<10x3xf32>
      %c7 = arith.constant 7 : index
      %c0_51 = arith.constant 0 : index
      %c0_52 = arith.constant 0 : index
      %73 = vector.load %arg6[%c7, %c0_51, %c0_52] : memref<9x10x48xf32, #tpu.memory_space<vmem>>, vector<1x10x48xf32>
      %74 = vector.shape_cast %73 : vector<1x10x48xf32> to vector<10x48xf32>
      %75 = vector.extract_strided_slice %36 {offsets = [0, 21], sizes = [48, 3], strides = [1, 1]} : vector<48x27xf32> to vector<48x3xf32>
      %cst_53 = arith.constant dense<0.000000e+00> : vector<10x3xf32>
      %76 = tpu.matmul %74, %75, %cst_53 {dimension_numbers = #tpu.dot_dimension_numbers<[1], [0], [0], [1], [0, 0, 1, 1], [], []>} : vector<10x48xf32>, vector<48x3xf32>, vector<10x3xf32> -> vector<10x3xf32>
      %77 = arith.addf %72, %76 : vector<10x3xf32>
      %c8 = arith.constant 8 : index
      %c0_54 = arith.constant 0 : index
      %c0_55 = arith.constant 0 : index
      %78 = vector.load %arg6[%c8, %c0_54, %c0_55] : memref<9x10x48xf32, #tpu.memory_space<vmem>>, vector<1x10x48xf32>
      %79 = vector.shape_cast %78 : vector<1x10x48xf32> to vector<10x48xf32>
      %80 = vector.extract_strided_slice %36 {offsets = [0, 24], sizes = [48, 3], strides = [1, 1]} : vector<48x27xf32> to vector<48x3xf32>
      %cst_56 = arith.constant dense<0.000000e+00> : vector<10x3xf32>
      %81 = tpu.matmul %79, %80, %cst_56 {dimension_numbers = #tpu.dot_dimension_numbers<[1], [0], [0], [1], [0, 0, 1, 1], [], []>} : vector<10x48xf32>, vector<48x3xf32>, vector<10x3xf32> -> vector<10x3xf32>
      %82 = arith.addf %77, %81 : vector<10x3xf32>
      %c0_57 = arith.constant 0 : index
      %c0_58 = arith.constant 0 : index
      %83 = vector.load %arg8[%c0_57, %c0_58] : memref<1x3xf32, #tpu.memory_space<vmem>>, vector<1x3xf32>
      %84 = vector.broadcast %83 : vector<1x3xf32> to vector<10x3xf32>
      %85 = arith.mulf %82, %84 : vector<10x3xf32>
      %c0_59 = arith.constant 0 : index
      %c0_60 = arith.constant 0 : index
      %86 = vector.load %arg7[%c0_59, %c0_60] : memref<10x1xf32, #tpu.memory_space<vmem>>, vector<10x1xf32>
      %87 = vector.broadcast %86 : vector<10x1xf32> to vector<10x3xf32>
      %88 = arith.addf %85, %87 : vector<10x3xf32>
      %c0_61 = arith.constant 0 : index
      %c0_62 = arith.constant 0 : index
      %c0_63 = arith.constant 0 : index
      %89 = vector.load %arg9[%c0_61, %c0_62, %c0_63] : memref<1x10x3xf32, #tpu.memory_space<vmem>>, vector<1x10x3xf32>
      %90 = vector.shape_cast %89 : vector<1x10x3xf32> to vector<10x3xf32>
      %91 = vector.shape_cast %88 : vector<10x3xf32> to vector<1x10x3xf32>
      tpu.vector_store %arg9[%c0_61, %c0_62, %c0_63], %91 {strides = array<i32>} : memref<1x10x3xf32, #tpu.memory_space<vmem>>, vector<1x10x3xf32>,
    } else {
    }
    return
  }
  func.func @transform_0(%arg0: i32, %arg1: i32) -> (i32, i32, i32) {
    %c0_i32 = arith.constant 0 : i32
    %c0_i32_0 = arith.constant 0 : i32
    return %arg0, %c0_i32, %arg1 : i32, i32, i32
  }
  func.func @transform_1(%arg0: i32, %arg1: i32) -> (i32, i32) {
    %c0_i32 = arith.constant 0 : i32
    %c0_i32_0 = arith.constant 0 : i32
    %c0_i32_1 = arith.constant 0 : i32
    return %c0_i32, %c0_i32_0 : i32, i32
  }
  func.func @transform_2(%arg0: i32, %arg1: i32) -> (i32, i32) {
    %c0_i32 = arith.constant 0 : i32
    %c0_i32_0 = arith.constant 0 : i32
    %c0_i32_1 = arith.constant 0 : i32
    return %c0_i32, %c0_i32_0 : i32, i32
  }
  func.func @transform_3(%arg0: i32, %arg1: i32) -> (i32, i32) {
    %c0_i32 = arith.constant 0 : i32
    %c0_i32_0 = arith.constant 0 : i32
    %c0_i32_1 = arith.constant 0 : i32
    return %c0_i32, %c0_i32_0 : i32, i32
  }
  func.func @transform_4(%arg0: i32, %arg1: i32) -> (i32, i32, i32) {
    %c0_i32 = arith.constant 0 : i32
    %c0_i32_0 = arith.constant 0 : i32
    %c0_i32_1 = arith.constant 0 : i32
    %c0_i32_2 = arith.constant 0 : i32
    return %c0_i32, %c0_i32_0, %c0_i32_1 : i32, i32, i32
  }
  func.func @transform_5(%arg0: i32, %arg1: i32) -> (i32, i32) {
    %c0_i32 = arith.constant 0 : i32
    %c0_i32_0 = arith.constant 0 : i32
    %c0_i32_1 = arith.constant 0 : i32
    return %c0_i32, %c0_i32_0 : i32, i32
  }
  func.func @transform_6(%arg0: i32, %arg1: i32) -> (i32, i32) {
    %c0_i32 = arith.constant 0 : i32
    %c0_i32_0 = arith.constant 0 : i32
    %c0_i32_1 = arith.constant 0 : i32
    return %c0_i32, %c0_i32_0 : i32, i32
  }
  func.func @transform_7(%arg0: i32, %arg1: i32) -> (i32, i32, i32) {
    %c0_i32 = arith.constant 0 : i32
    %c0_i32_0 = arith.constant 0 : i32
    %c0_i32_1 = arith.constant 0 : i32
    return %arg0, %c0_i32, %c0_i32_0 : i32, i32, i32
  }
}

</mosaic_0001>

<bundles_post_ra>
// kernel: my3d_forward.1
= control target key start
LH: loop header
LB: loop body
LE: loop exit
PB: predicated region body
PF: predicated region fallthrough
CT: control target
= control target key end

     0   :  { %s2914_s24 = smov 0   ;;  %s2916_s25 = smov 0   ;;  %s3213_s0 = inlined_call_operand.vmem [shape: bf16[2,108,512], index: 0, kind: input, shape index: {}]   ;;  %s3214_s1 = inlined_call_operand.vmem [shape: bf16[16,108], index: 1, kind: input, shape index: {}]   ;;  %s3215_s2 = inlined_call_operand.vmem [shape: f32[16,1], index: 2, kind: input, shape index: {}]   ;;  %s3216_s3 = inlined_call_operand.vmem [shape: bf16[512,27], index: 3, kind: input, shape index: {}]   ;;  %s3217_s4 = inlined_call_operand.vmem [shape: f32[9,10,48], index: 4, kind: input, shape index: {}]   ;;  %s3218_s5 = inlined_call_operand.vmem [shape: f32[10,1], index: 5, kind: input, shape index: {}]   ;;  %s3219_s6 = inlined_call_operand.vmem [shape: f32[1,3], index: 6, kind: input, shape index: {}]   ;;  %s3220_s7 = inlined_call_operand.vmem [shape: f32[2,10,3], index: 7, kind: output, shape index: {}]  }
   0x1   :  { %s2918_s26 = smov 0  }
   0x2 LB: > { %s29_s27 = sadd.s32 1, %s2856_s25  ;;  %p2086_p0 = scmp.ge.s32.totalorder %s2860_s26, 1  ;;  %s2860_s26 = sphi %s2918_s26, %s17_s26   ;;  %s2856_s25 = sphi %s2916_s25, %s3222_s25   ;;  %s2852_s24 = sphi %s2914_s24, %s3221_s24  }
   0x3   : > { %p31_p1 = scmp.ge.s32.totalorder %s29_s27, 2  ;;  %p256_p2 = scmp.lt.s32.totalorder %s2860_s26, 3 }
   0x5   : > { %s3224_s27 = smov (%p31_p1, %s29_s27), 0  ;;  %p257_p3 = pnand %p2086_p0, %p256_p2 }
   0x6   : > { %p293_p4 = scmp.lt.s32.totalorder (!%p257_p3), %s2852_s24, 1  ;;  %v2862_v0 = vmov (!%p257_p3), 0   ;;  %v347_v1 = vld [vmem:[%s3215_s2] sm:$0xff] (!%p257_p3)  ;;  %v348_v2 = vld [vmem:[%s3215_s2 + $0x8] sm:$0xff] (!%p257_p3)  ;;  %vm504_vm0 = vcmask (!%p257_p3), 1045504   ;;  %vm500_vm1 = vcmask (!%p257_p3), 883712  }
   0x7   : > { %260 = sbr.rel (%p257_p3) target bundleno = 1046 (0x416), region = 48  ;;  %549 = vmatprep.mubr.bf16.mxu0 (!%p257_p3), %v2862_v0  ;;  %592 = vmatprep.mubr.bf16.mxu1 (!%p257_p3), %v2862_v0  ;;  %v2806_v31 = vld [vmem:[%s3216_s3 + $0x40] sm:$0xff] (!%p257_p3)   ;;  %v2808_v36 = vld [vmem:[%s3216_s3 + $0x48] sm:$0xff] (!%p257_p3)   ;;  %v2810_v38 = vld [vmem:[%s3216_s3 + $0x50] sm:$0xff] (!%p257_p3)   ;;  %s2863_s15 = smov (!%p257_p3), 64   ;;  %vm2865_vm2 = vmmov (!%p257_p3), 0  }
   0x8   : > { %2641 = vset.pattern.permute.xlu0 (!%p257_p3), %v2862_v0  ;;  %2762 = vset.pattern.permute.xlu1 (!%p257_p3), %v2862_v0  ;;  %v2805_v34 = vld [vmem:[%s3214_s1] sm:$0xff] (!%p257_p3)   ;;  %v2991_v37 = vld [vmem:[%s3216_s3 + $0x8] sm:$0xff] (!%p257_p3)   ;;  %v3000_v39 = vld [vmem:[%s3216_s3 + $0x10] sm:$0xff] (!%p257_p3)   ;;  %vm963_vm3 = vcmask (!%p257_p3), 523264   ;;  %vm312_vm4 = vcmask (!%p257_p3), 220160   ;;  %s2866_s23 = smov (!%p257_p3), 125  }
   0x9   : > { %351 = vperm.xlu0 (!%p257_p3), %2641, %v347_v1   ;;  %v2983_v35 = vld [vmem:[%s3216_s3] sm:$0xff] (!%p257_p3)   ;;  %v2812_v40 = vld [vmem:[%s3216_s3 + $0x58] sm:$0xff] (!%p257_p3)   ;;  %v2816_v44 = vld [vmem:[%s3216_s3 + $0x68] sm:$0xff] (!%p257_p3)   ;;  %s2867_s28 = smov (!%p257_p3), 122   ;;  %vm1095_vm5 = vcmask (!%p257_p3), 392192   ;;  %s2868_s8 = smov (!%p257_p3), 119  }
   0xa   : > { %v3010_v41 = vld [vmem:[%s3216_s3 + $0x18] sm:$0xff] (!%p257_p3)   ;;  %v2814_v42 = vld [vmem:[%s3216_s3 + $0x60] sm:$0xff] (!%p257_p3)   ;;  %v2817_v45 = vld [vmem:[%s3216_s3 + $0x28] sm:$0xff] (!%p257_p3)   ;;  %s2869_s9 = smov (!%p257_p3), 116   ;;  %s2870_s10 = smov (!%p257_p3), 113   ;;  %vm2011_vm6 = vcmask (!%p257_p3), 17408  }
   0xb   : > { %v2815_v43 = vld [vmem:[%s3216_s3 + $0x20] sm:$0xff] (!%p257_p3)   ;;  %v2818_v46 = vld [vmem:[%s3216_s3 + $0x70] sm:$0xff] (!%p257_p3)   ;;  %v2820_v48 = vld [vmem:[%s3216_s3 + $0x78] sm:$0xff] (!%p257_p3)   ;;  %s2871_s11 = smov (!%p257_p3), 110   ;;  %s2873_s13 = smov (!%p257_p3), 104   ;;  %vm2009_vm7 = vcmask (!%p257_p3), 23552  }
   0xc   : > { %v2819_v47 = vld [vmem:[%s3216_s3 + $0x30] sm:$0xff] (!%p257_p3)   ;;  %v2821_v49 = vld [vmem:[%s3216_s3 + $0x38] sm:$0xff] (!%p257_p3)   ;;  %v2822_v50 = vld [vmem:[%s3216_s3 + $0xc0] sm:$0xff] (!%p257_p3)  }
   0xd   : > { %356 = vperm.xlu0 (!%p257_p3), %2641, %v348_v2  }
   0xe   : > { %s3226_s24 = smov (!%p293_p4, %s2852_s24), 1 }
   0xf   : > { %s2604_s30 = smul.u32 224, %s3226_s24  ;;  %s2194_s16 = sshll.u32 %s3226_s24, 4 }
  0x10   : > { %s306_s19 = scalar_lea.vmem %s3220_s7, %s2194_s16 }
  0x11   : > { %s2944_s12 = scalar_lea.vmem %s3213_s0, %s2604_s30 }
  0x12   : > { %v2763_v3 = vld [vmem:[%s2944_s12 + $0x4] ss:$16 sps:$4 sm:$0xff]   ;;  %v2765_v4 = vld [vmem:[%s2944_s12 + $0xc] ss:$16 sps:$4 sm:$0xff]   ;;  %v2767_v5 = vld [vmem:[%s2944_s12] ss:$16 sps:$4 sm:$0xff]  }
  0x13   : > { %517 = vmatprep.subr.bf16.mxu0 %v2763_v3  ;;  %v2768_v6 = vld [vmem:[%s2944_s12 + $0x8] ss:$16 sps:$4 sm:$0xff]   ;;  %560 = vmatprep.subr.bf16.mxu1 %v2765_v4  ;;  %v2769_v7 = vld [vmem:[%s2944_s12 + $0x24] ss:$16 sps:$4 sm:$0xff]   ;;  %v2771_v8 = vld [vmem:[%s2944_s12 + $0x2c] ss:$16 sps:$4 sm:$0xff]  }
  0x14   : > { %518 = vmatpush1.bf16.msra.mxu0 %v2767_v5  ;;  %561 = vmatpush1.bf16.msra.mxu1 %v2768_v6  ;;  %v2773_v9 = vld [vmem:[%s2944_s12 + $0x20] ss:$16 sps:$4 sm:$0xff]   ;;  %v2774_v10 = vld [vmem:[%s2944_s12 + $0x28] ss:$16 sps:$4 sm:$0xff]   ;;  %v2775_v11 = vld [vmem:[%s2944_s12 + $0x44] ss:$16 sps:$4 sm:$0xff]  }
  0x15   : > { %519 = vmatprep.subr.bf16.mxu0 %v2769_v7  ;;  %562 = vmatprep.subr.bf16.mxu1 %v2771_v8  ;;  %v2777_v12 = vld [vmem:[%s2944_s12 + $0x4c] ss:$16 sps:$4 sm:$0xff]   ;;  %v2779_v13 = vld [vmem:[%s2944_s12 + $0x40] ss:$16 sps:$4 sm:$0xff]   ;;  %v2780_v14 = vld [vmem:[%s2944_s12 + $0x48] ss:$16 sps:$4 sm:$0xff]  }
  0x16   : > { %v2781_v15 = vld [vmem:[%s2944_s12 + $0x64] ss:$16 sps:$4 sm:$0xff]   ;;  %v2783_v16 = vld [vmem:[%s2944_s12 + $0x6c] ss:$16 sps:$4 sm:$0xff]   ;;  %v2785_v17 = vld [vmem:[%s2944_s12 + $0x60] ss:$16 sps:$4 sm:$0xff]  }
  0x17   : > { %v2786_v18 = vld [vmem:[%s2944_s12 + $0x68] ss:$16 sps:$4 sm:$0xff]   ;;  %v2787_v19 = vld [vmem:[%s2944_s12 + $0x84] ss:$16 sps:$4 sm:$0xff]   ;;  %v2789_v20 = vld [vmem:[%s2944_s12 + $0x8c] ss:$16 sps:$4 sm:$0xff]  }
  0x18   : > { %520 = vmatpush1.bf16.msra.mxu0 %v2773_v9  ;;  %563 = vmatpush1.bf16.msra.mxu1 %v2774_v10  ;;  %v2791_v21 = vld [vmem:[%s2944_s12 + $0x80] ss:$16 sps:$4 sm:$0xff]   ;;  %v2792_v22 = vld [vmem:[%s2944_s12 + $0x88] ss:$16 sps:$4 sm:$0xff]   ;;  %v2793_v23 = vld [vmem:[%s2944_s12 + $0xa4] ss:$16 sps:$4 sm:$0xff]  }
  0x19   : > { %521 = vmatprep.subr.bf16.mxu0 %v2775_v11  ;;  %564 = vmatprep.subr.bf16.mxu1 %v2777_v12  ;;  %v2795_v24 = vld [vmem:[%s2944_s12 + $0xac] ss:$16 sps:$4 sm:$0xff]   ;;  %v2797_v25 = vld [vmem:[%s2944_s12 + $0xa0] ss:$16 sps:$4 sm:$0xff]   ;;  %v2798_v30 = vld [vmem:[%s2944_s12 + $0xa8] ss:$16 sps:$4 sm:$0xff]  }
  0x1a   : > { %v2799_v26 = vld [vmem:[%s2944_s12 + $0xc4] ss:$16 sps:$4 sm:$0x3f]   ;;  %v2801_v27 = vld [vmem:[%s2944_s12 + $0xcc] ss:$16 sps:$4 sm:$0x3f]  }
  0x1b   : > { %v2803_v28 = vld [vmem:[%s2944_s12 + $0xc0] ss:$16 sps:$4 sm:$0x3f]   ;;  %v2804_v29 = vld [vmem:[%s2944_s12 + $0xc8] ss:$16 sps:$4 sm:$0x3f]  }
  0x1c   : > { %522 = vmatpush1.bf16.msra.mxu0 %v2779_v13  ;;  %565 = vmatpush1.bf16.msra.mxu1 %v2780_v14  ;;  %v506_v32 = vsel %vm504_vm0, %v2803_v28, 0  ;;  %v512_v33 = vsel %vm504_vm0, %v2804_v29, 0  ;;  %v2834_v28 = vld [vmem:[%s3216_s3 + $0xf0] sm:$0xff]   ;;  %s2872_s12 = smov 107  }
  0x1d   : > { %523 = vmatprep.subr.bf16.mxu0 %v2781_v15  ;;  %566 = vmatprep.subr.bf16.mxu1 %v2783_v16  ;;  %v2835_v29 = vld [vmem:[%s3216_s3 + $0xb0] sm:$0xff]  }
  0x20   : > { %524 = vmatpush1.bf16.msra.mxu0 %v2785_v17  ;;  %567 = vmatpush1.bf16.msra.mxu1 %v2786_v18  ;;  %v2823_v17 = vld [vmem:[%s3216_s3 + $0x80] sm:$0xff]   ;;  %v2824_v18 = vld [vmem:[%s3216_s3 + $0xc8] sm:$0xff]  }
  0x21   : > { %525 = vmatprep.subr.bf16.mxu0 %v2787_v19  ;;  %568 = vmatprep.subr.bf16.mxu1 %v2789_v20  ;;  %v2825_v19 = vld [vmem:[%s3216_s3 + $0x88] sm:$0xff]   ;;  %v2826_v20 = vld [vmem:[%s3216_s3 + $0xd0] sm:$0xff]  }
  0x24   : > { %526 = vmatpush1.bf16.msra.mxu0 %v2791_v21  ;;  %569 = vmatpush1.bf16.msra.mxu1 %v2792_v22  ;;  %v2827_v21 = vld [vmem:[%s3216_s3 + $0x90] sm:$0xff]   ;;  %v2828_v22 = vld [vmem:[%s3216_s3 + $0xd8] sm:$0xff]  }
  0x25   : > { %527 = vmatprep.subr.bf16.mxu0 %v2793_v23  ;;  %570 = vmatprep.subr.bf16.mxu1 %v2795_v24  ;;  %v2829_v23 = vld [vmem:[%s3216_s3 + $0x98] sm:$0xff]   ;;  %v2830_v24 = vld [vmem:[%s3216_s3 + $0xe0] sm:$0xff]  }
  0x28   : > { %528 = vmatpush1.bf16.msra.mxu0 %v2797_v25  ;;  %571 = vmatpush1.bf16.msra.mxu1 %v2798_v30  ;;  %v2831_v25 = vld [vmem:[%s3216_s3 + $0xa0] sm:$0xff]   ;;  %v2836_v30 = vld [vmem:[%s3216_s3 + $0xf8] sm:$0xff]  }
  0x29   : > { %2119 = vmatprep.subr.msk.bf16.mxu0 %vm504_vm0, %v2799_v26  ;;  %2121 = vmatprep.subr.msk.bf16.mxu1 %vm504_vm0, %v2801_v27  ;;  %v2832_v26 = vld [vmem:[%s3216_s3 + $0xe8] sm:$0xff]  }
  0x2a   : > { %v2833_v27 = vld [vmem:[%s3216_s3 + $0xa8] sm:$0xff]  }
  0x2c   : > { %530 = vmatpush1.bf16.msra.mxu0 %v506_v32  ;;  %573 = vmatpush1.bf16.msra.mxu1 %v512_v33  ;;  %v2864_v32 = vmov 0.0  }
  0x2d   : > { %2195 = vmatprep.subr.bf16.mxu1 %v2806_v31  ;;  %v2837_v31 = vld [vmem:[%s3216_s3 + $0xb8] sm:$0xff]   ;;  %313 = vst.msk [vmem:[#allocation2] sm:$0xff] %vm312_vm4, %v2864_v32  ;;  %314 = vst.msk [vmem:[#allocation2 + $0x8] sm:$0xff] %vm312_vm4, %v2864_v32 }
  0x2e   : > { %315 = vst.msk [vmem:[#allocation2 + $0x10] sm:$0xff] %vm312_vm4, %v2864_v32  ;;  %316 = vst.msk [vmem:[#allocation2 + $0x18] sm:$0xff] %vm312_vm4, %v2864_v32 }
  0x2f   : > { %2120 = vmatmul.mubr.msk.bf16.vlgmr.msra.gmra.mrb[0].mxu0 %vm500_vm1, %v2805_v34  ;;  %2122 = vmatmul.mubr.msk.bf16.vlgmr.msra.gmra.mrb[0].mxu1 %vm500_vm1, %v2805_v34 }
  0x30   : > { %2196 = vmatpush3.bf16.msra.mxu1 %v2983_v35 }
  0x31   : > { %2197 = vmatprep.subr.bf16.mxu1 %v2808_v36 }
  0x34   : > { %2198 = vmatpush3.bf16.msra.mxu1 %v2991_v37 }
  0x35   : > { %2199 = vmatprep.subr.bf16.mxu1 %v2810_v38 }
  0x38   : > { %2200 = vmatpush3.bf16.msra.mxu1 %v3000_v39 }
  0x39   : > { %2201 = vmatprep.subr.bf16.mxu1 %v2812_v40 }
  0x3c   : > { %2202 = vmatpush3.bf16.msra.mxu1 %v3010_v41 }
  0x3d   : > { %2203 = vmatprep.subr.bf16.mxu1 %v2814_v42 }
  0x40   : > { %2204 = vmatpush3.bf16.msra.mxu1 %v2815_v43 }
  0x41   : > { %2205 = vmatprep.subr.bf16.mxu1 %v2816_v44  ;;  %v953_v44 = vld [vmem:[#allocation2] sm:$0xff] }
  0x44   : > { %2206 = vmatpush3.bf16.msra.mxu1 %v2817_v45 }
  0x45   : > { %2207 = vmatprep.subr.bf16.mxu1 %v2818_v46 }
  0x48   : > { %2208 = vmatpush3.bf16.msra.mxu1 %v2819_v47 }
  0x49   : > { %2209 = vmatprep.subr.bf16.mxu1 %v2820_v48  ;;  %v954_v48 = vld [vmem:[#allocation2 + $0x8] sm:$0xff] }
  0x4c   : > { %2210 = vmatpush3.bf16.msra.mxu1 %v2821_v49 }
  0x4d   : > { %2217 = vmatprep.subr.bf16.mxu1 %v2822_v50 }
  0x88   : > { %v352_v51 = vpop.permute.xlu0 %351 }
  0x8c   : > { %v357_v52 = vpop.permute.xlu0 %356 }
 0x102   : > { %v551_v53 = vpop.f32.mrb[0].mxu0  ;;  %v594_v54 = vpop.f32.mrb[0].mxu1 }
 0x103   : > { %v552_v55 = vadd.f32 %v551_v53, %v352_v51  ;;  %v595_v56 = vadd.f32 %v594_v54, %v352_v51  ;;  %v553_v57 = vpop.f32.mrb[1].mxu0  ;;  %v596_v58 = vpop.f32.mrb[1].mxu1 }
 0x104   : > { %v554_v59 = vadd.f32 %v553_v57, %v352_v51  ;;  %v597_v60 = vadd.f32 %v596_v58, %v352_v51  ;;  %v555_v61 = vpop.f32.mrb[2].mxu0  ;;  %v598_v62 = vpop.f32.mrb[2].mxu1 }
 0x105   : > { %v556_v63 = vadd.f32 %v555_v61, %v357_v52  ;;  %v599_v0 = vadd.f32 %v598_v62, %v357_v52  ;;  %v557_v1 = vpop.f32.mrb[3].mxu0  ;;  %v600_v2 = vpop.f32.mrb[3].mxu1  ;;  %v603_v5 = vmax.f32 %v552_v55, 0.0  ;;  %v605_v6 = vmax.f32 %v595_v56, 0.0 }
 0x106   : > { %v558_v3 = vadd.f32 %v557_v1, %v357_v52  ;;  %v601_v4 = vadd.f32 %v600_v2, %v357_v52  ;;  %v604_v9 = vmax.f32 %v554_v59, 0.0  ;;  %v606_v10 = vmax.f32 %v597_v60, 0.0 }
 0x107   : > { %v607_v7 = vmax.f32 %v556_v63, 0.0  ;;  %v609_v8 = vmax.f32 %v599_v0, 0.0 }
 0x108   : > { %v608_v11 = vmax.f32 %v558_v3, 0.0  ;;  %v610_v12 = vmax.f32 %v601_v4, 0.0 }
 0x109   : > { %v611_v13 = vpack.c.bf16 %v607_v7, %v603_v5  ;;  %v613_v14 = vpack.c.bf16 %v609_v8, %v605_v6 }
 0x10a   : > { %v612_v15 = vpack.c.bf16 %v608_v11, %v604_v9  ;;  %v614_v16 = vpack.c.bf16 %v610_v12, %v606_v10  ;;  %v2157_v9 = vld [vmem:[%s3217_s4 + $0x10] sm:$0xff]  ;;  %v1996_v10 = vld [vmem:[%s3218_s5 + $0x8] sm:$0x3]  ;;  %v1995_v11 = vld [vmem:[%s3218_s5] sm:$0xff] }
 0x10b   : > { %2357 = vmatprep.mubr.msk.f32.mxu0 %vm1095_vm5, %v2157_v9 }
 0x10c   : > { %1012 = vrot.lane.b32.xlu1 %v614_v16, %s2863_s15  ;;  %903 = vmatprep.mubr.bf16.mxu1 %v612_v15 }
 0x10d   : > { %904 = vmatmul.mubr.bf16.vlgmr.msra.gmra.mrb[4].mxu1 %v611_v13 }
 0x10e   : > { %2218 = vmatpush3.bf16.msra.mxu1 %v2823_v17  ;;  %944 = vmatprep.mubr.bf16.mxu1 %v614_v16 }
 0x10f   : > { %2219 = vmatprep.subr.bf16.mxu1 %v2824_v18 }
 0x112   : > { %2220 = vmatpush3.bf16.msra.mxu1 %v2825_v19 }
 0x113   : > { %2221 = vmatprep.subr.bf16.mxu1 %v2826_v20 }
 0x116   : > { %2222 = vmatpush3.bf16.msra.mxu1 %v2827_v21 }
 0x117   : > { %2223 = vmatprep.subr.bf16.mxu1 %v2828_v22 }
 0x11a   : > { %2224 = vmatpush3.bf16.msra.mxu1 %v2829_v23 }
 0x11b   : > { %2225 = vmatprep.subr.bf16.mxu1 %v2830_v24  ;;  %v2158_v24 = vld [vmem:[%s3217_s4 + $0x18] sm:$0x3] }
 0x11e   : > { %2226 = vmatpush3.bf16.msra.mxu1 %v2831_v25  ;;  %v1066_v25 = vld [vmem:[%s3217_s4] sm:$0xff] }
 0x11f   : > { %2227 = vmatprep.subr.bf16.mxu1 %v2832_v26 }
 0x122   : > { %2228 = vmatpush3.bf16.msra.mxu1 %v2833_v27 }
 0x123   : > { %2229 = vmatprep.subr.bf16.mxu1 %v2834_v28 }
 0x126   : > { %2230 = vmatpush3.bf16.msra.mxu1 %v2835_v29 }
 0x127   : > { %2231 = vmatprep.subr.bf16.mxu1 %v2836_v30 }
 0x12a   : > { %2232 = vmatpush3.bf16.msra.mxu1 %v2837_v31 }
 0x12b   : > { %2321 = vmatprep.subr.bf16.mxu1 %v2864_v32 }
 0x12d   : > { %945 = vmatmul.mubr.bf16.vlgmr.msra.gmra.mrb[8].mxu1 %v613_v14 }
 0x12e   : > { %2322 = vmatpush3.bf16.msra.mxu1 %v2983_v35  ;;  %2329 = vmatprep.mubr.msk.bf16.mxu1 %vm2865_vm2, %v2864_v32 }
 0x12f   : > { %2323 = vmatprep.subr.bf16.mxu1 %v2864_v32 }
 0x132   : > { %2324 = vmatpush3.bf16.msra.mxu1 %v2991_v37 }
 0x133   : > { %2325 = vmatprep.subr.bf16.mxu1 %v2864_v32 }
 0x136   : > { %2326 = vmatpush3.bf16.msra.mxu1 %v3000_v39 }
 0x137   : > { %2327 = vmatprep.subr.bf16.mxu1 %v2864_v32 }
 0x13a   : > { %2328 = vmatpush3.bf16.msra.mxu1 %v3010_v41 }
 0x13b   : > { %2333 = vmatprep.subr.bf16.mxu1 %v2864_v32 }
 0x13d   : > { %2330 = vmatmul.mubr.msk.bf16.vlgmr.msra.gmra.mrb[12].mxu1 %vm963_vm3, %v611_v13 }
 0x13e   : > { %2334 = vmatpush3.bf16.msra.mxu1 %v2983_v35  ;;  %2341 = vmatprep.mubr.msk.bf16.mxu1 %vm2865_vm2, %v2864_v32 }
 0x13f   : > { %2335 = vmatprep.subr.bf16.mxu1 %v2864_v32 }
 0x142   : > { %2336 = vmatpush3.bf16.msra.mxu1 %v2991_v37 }
 0x143   : > { %2337 = vmatprep.subr.bf16.mxu1 %v2864_v32 }
 0x146   : > { %2338 = vmatpush3.bf16.msra.mxu1 %v3000_v39 }
 0x147   : > { %2339 = vmatprep.subr.bf16.mxu1 %v2864_v32 }
 0x14a   : > { %2340 = vmatpush3.bf16.msra.mxu1 %v3010_v41 }
 0x17e   : > { %v1013_v33 = vpop.permute.xlu1 %1012 }
 0x17f   : > { %2342 = vmatmul.mubr.msk.bf16.vlgmr.msra.gmra.mrb[16].mxu1 %vm963_vm3, %v1013_v33 }
 0x1e0   : > { %v2211_v34 = vpop.f32.mrb[4].mxu1 }
 0x1e1   : > { %v2212_v35 = vpop.f32.mrb[5].mxu1 }
 0x1e2   : > { %v2213_v36 = vadd.f32 %v2212_v35, %v2211_v34  ;;  %v2214_v37 = vpop.f32.mrb[6].mxu1  ;;  %v1067_v35 = vld [vmem:[%s3217_s4 + $0x8] sm:$0x3] }
 0x1e3   : > { %v2215_v38 = vpop.f32.mrb[7].mxu1 }
 0x1e4   : > { %v2216_v39 = vadd.f32 %v2215_v38, %v2214_v37 }
 0x200   : > { %v2233_v40 = vpop.f32.mrb[8].mxu1 }
 0x201   : > { %v2234_v41 = vpop.f32.mrb[9].mxu1 }
 0x202   : > { %v2235_v42 = vadd.f32 %v2234_v41, %v2233_v40  ;;  %v2236_v43 = vpop.f32.mrb[10].mxu1 }
 0x203   : > { %v2237_v45 = vpop.f32.mrb[11].mxu1 }
 0x204   : > { %v947_v46 = vadd.f32 %v2235_v42, %v2213_v36  ;;  %v2238_v47 = vadd.f32 %v2237_v45, %v2236_v43  ;;  %v2163_v36 = vld [vmem:[%s3217_s4 + $0x20] sm:$0xff] }
 0x206   : > { %v955_v49 = vadd.f32 %v953_v44, %v947_v46  ;;  %v950_v50 = vadd.f32 %v2238_v47, %v2216_v39 }
 0x208   : > { %958 = vst.msk [vmem:[#allocation2] sm:$0xff] %vm312_vm4, %v955_v49  ;;  %v956_v51 = vadd.f32 %v954_v48, %v950_v50  ;;  %v2164_v49 = vld [vmem:[%s3217_s4 + $0x28] sm:$0x3]  ;;  %v2167_v50 = vld [vmem:[%s3217_s4 + $0x30] sm:$0xff] }
 0x20a   : > { %959 = vst.msk [vmem:[#allocation2 + $0x8] sm:$0xff] %vm312_vm4, %v956_v51 }
 0x20f   : > { %v3102_v54 = vld [vmem:[#allocation2] sm:$0xff] }
 0x210   : > { %v1001_v52 = vpop.f32.mrb[12].mxu1 }
 0x211   : > { %1009 = vst.msk [vmem:[#allocation2 + $0x10] sm:$0xff] %vm312_vm4, %v1001_v52  ;;  %v2331_v53 = vpop.f32.mrb[13].mxu1  ;;  %v3104_v55 = vld [vmem:[#allocation2 + $0x8] sm:$0xff] }
 0x212   : > { %v1004_v56 = vpop.f32.mrb[14].mxu1  ;;  %v2647_v57 = vpack.i.bf16 %v3104_v55, %v3102_v54  ;;  %v2496_v26 = vpack.c.bf16 %v3104_v55, %v3102_v54 }
 0x213   : > { %1010 = vst.msk [vmem:[#allocation2 + $0x18] sm:$0xff] %vm312_vm4, %v1004_v56  ;;  %v2332_v58 = vpop.f32.mrb[15].mxu1 }
 0x214   : > { %2648 = vrot.lane.b32.xlu0 %v2647_v57, %s2866_s23 }
 0x218   : > { %v1062_v59 = vld [vmem:[#allocation2 + $0x10] sm:$0xff] }
 0x219   : > { %v1064_v62 = vsub.f32 %v3102_v54, %v1062_v59 }
 0x21a   : > { %v1063_v60 = vld [vmem:[#allocation2 + $0x18] sm:$0xff] }
 0x21b   : > { %v1065_v61 = vsub.f32 %v3104_v55, %v1063_v60 }
 0x21d   : > { %v3111_v63 = vpack.c.bf16 %v1065_v61, %v1064_v62  ;;  %v2667_v8 = vpack.i.bf16 %v1065_v61, %v1064_v62 }
 0x252   : > { %v1051_v0 = vpop.f32.mrb[16].mxu1 }
 0x253   : > { %v2343_v1 = vpop.f32.mrb[17].mxu1  ;;  %v1060_v3 = vsub.f32 %v3102_v54, %v1051_v0  ;;  %v2171_v0 = vld [vmem:[%s3217_s4 + $0x40] sm:$0xff] }
 0x254   : > { %v1054_v2 = vpop.f32.mrb[18].mxu1 }
 0x255   : > { %v1061_v4 = vsub.f32 %v3104_v55, %v1054_v2  ;;  %v2344_v5 = vpop.f32.mrb[19].mxu1 }
 0x257   : > { %v2657_v6 = vpack.i.bf16 %v1061_v4, %v1060_v3  ;;  %v2492_v7 = vpack.c.bf16 %v1061_v4, %v1060_v3 }
 0x259   : > { %2658 = vrot.lane.b32.xlu0 %v2657_v6, %s2867_s28  ;;  %2643 = vrot.lane.b32.xlu1 %v2657_v6, %s2866_s23 }
 0x25d   : > { %2668 = vrot.lane.b32.xlu0 %v2667_v8, %s2867_s28  ;;  %2653 = vrot.lane.b32.xlu1 %v2667_v8, %s2866_s23 }
 0x261   : > { %2678 = vrot.lane.b32.xlu0 %v2647_v57, %s2868_s8  ;;  %2663 = vrot.lane.b32.xlu1 %v2647_v57, %s2867_s28 }
 0x265   : > { %2688 = vrot.lane.b32.xlu0 %v2657_v6, %s2869_s9  ;;  %2673 = vrot.lane.b32.xlu1 %v2657_v6, %s2868_s8 }
 0x269   : > { %2698 = vrot.lane.b32.xlu0 %v2667_v8, %s2869_s9  ;;  %2683 = vrot.lane.b32.xlu1 %v2667_v8, %s2868_s8 }
 0x26d   : > { %2708 = vrot.lane.b32.xlu0 %v2647_v57, %s2870_s10  ;;  %2693 = vrot.lane.b32.xlu1 %v2647_v57, %s2869_s9 }
 0x271   : > { %2718 = vrot.lane.b32.xlu0 %v2657_v6, %s2871_s11  ;;  %2703 = vrot.lane.b32.xlu1 %v2657_v6, %s2870_s10 }
 0x275   : > { %2728 = vrot.lane.b32.xlu0 %v2667_v8, %s2871_s11  ;;  %2713 = vrot.lane.b32.xlu1 %v2667_v8, %s2870_s10 }
 0x279   : > { %2738 = vrot.lane.b32.xlu0 %v2647_v57, %s2872_s12  ;;  %2723 = vrot.lane.b32.xlu1 %v2647_v57, %s2871_s11 }
 0x27d   : > { %2748 = vrot.lane.b32.xlu0 %v2657_v6, %s2873_s13  ;;  %2733 = vrot.lane.b32.xlu1 %v2657_v6, %s2872_s12 }
 0x281   : > { %2758 = vrot.lane.b32.xlu0 %v2667_v8, %s2873_s13  ;;  %2743 = vrot.lane.b32.xlu1 %v2667_v8, %s2872_s12 }
 0x285   : > { %2004 = vperm.xlu0 %2641, %v1996_v10   ;;  %2753 = vrot.lane.b32.xlu1 %v2647_v57, %s2873_s13 }
 0x286   : > { %v2649_v12 = vpop.permute.xlu0 %2648 }
 0x287   : > { %v2651_v14 = vunpack.i.h.bf16 %v2649_v12  ;;  %v2650_v15 = vunpack.i.l.bf16 %v2649_v12 }
 0x289   : > { %1999 = vperm.xlu1 %2762, %v1995_v11   ;;  %v2484_v20 = vpack.c.bf16 %v2651_v14, %v2650_v15  ;;  %v2175_v14 = vld [vmem:[%s3217_s4 + $0x50] sm:$0xff] }
 0x2cb   : > { %v2644_v13 = vpop.permute.xlu1 %2643  ;;  %v2659_v27 = vpop.permute.xlu0 %2658 }
 0x2cc   : > { %v2646_v16 = vunpack.i.h.bf16 %v2644_v13  ;;  %v2645_v17 = vunpack.i.l.bf16 %v2644_v13  ;;  %v2661_v28 = vunpack.i.h.bf16 %v2659_v27  ;;  %v2660_v29 = vunpack.i.l.bf16 %v2659_v27  ;;  %v2172_v13 = vld [vmem:[%s3217_s4 + $0x48] sm:$0x3]  ;;  %v2176_v27 = vld [vmem:[%s3217_s4 + $0x58] sm:$0x3] }
 0x2ce   : > { %v2480_v18 = vpack.c.bf16 %v2646_v16, %v2645_v17  ;;  %v2504_v31 = vpack.c.bf16 %v2661_v28, %v2660_v29  ;;  %v2179_v28 = vld [vmem:[%s3217_s4 + $0x60] sm:$0xff] }
 0x2cf   : > { %v2654_v19 = vpop.permute.xlu1 %2653  ;;  %v2669_v34 = vpop.permute.xlu0 %2668 }
 0x2d0   : > { %v2656_v21 = vunpack.i.h.bf16 %v2654_v19  ;;  %v2655_v22 = vunpack.i.l.bf16 %v2654_v19  ;;  %2481 = vmatprep.subr.bf16.mxu0 %v2480_v18  ;;  %v2671_v37 = vunpack.i.h.bf16 %v2669_v34  ;;  %v2670_v38 = vunpack.i.l.bf16 %v2669_v34 }
 0x2d1   : > { %2483 = vmatpush3.bf16.msra.mxu0 %v2480_v18 }
 0x2d2   : > { %2485 = vmatprep.subr.bf16.mxu0 %v2484_v20  ;;  %v2488_v23 = vpack.c.bf16 %v2656_v21, %v2655_v22  ;;  %v2512_v41 = vpack.c.bf16 %v2671_v37, %v2670_v38 }
 0x2d3   : > { %v2664_v30 = vpop.permute.xlu1 %2663  ;;  %v2679_v44 = vpop.permute.xlu0 %2678 }
 0x2d4   : > { %v2666_v32 = vunpack.i.h.bf16 %v2664_v30  ;;  %v2665_v33 = vunpack.i.l.bf16 %v2664_v30  ;;  %v2681_v45 = vunpack.i.h.bf16 %v2679_v44  ;;  %v2680_v46 = vunpack.i.l.bf16 %v2679_v44 }
 0x2d5   : > { %2487 = vmatpush3.bf16.msra.mxu0 %v2484_v20 }
 0x2d6   : > { %2489 = vmatprep.subr.bf16.mxu0 %v2488_v23  ;;  %v2508_v39 = vpack.c.bf16 %v2666_v32, %v2665_v33  ;;  %v2520_v51 = vpack.c.bf16 %v2681_v45, %v2680_v46 }
 0x2d7   : > { %v2674_v40 = vpop.permute.xlu1 %2673  ;;  %v2689_v54 = vpop.permute.xlu0 %2688 }
 0x2d8   : > { %v2676_v42 = vunpack.i.h.bf16 %v2674_v40  ;;  %v2675_v43 = vunpack.i.l.bf16 %v2674_v40  ;;  %v2691_v55 = vunpack.i.h.bf16 %v2689_v54  ;;  %v2690_v56 = vunpack.i.l.bf16 %v2689_v54 }
 0x2d9   : > { %2491 = vmatpush3.bf16.msra.mxu0 %v2488_v23 }
 0x2da   : > { %2493 = vmatprep.subr.bf16.mxu0 %v2492_v7  ;;  %v2516_v47 = vpack.c.bf16 %v2676_v42, %v2675_v43  ;;  %v2528_v59 = vpack.c.bf16 %v2691_v55, %v2690_v56  ;;  %v2183_v42 = vld [vmem:[%s3217_s4 + $0x70] sm:$0xff]  ;;  %v2184_v55 = vld [vmem:[%s3217_s4 + $0x78] sm:$0x3]  ;;  %v2187_v56 = vld [vmem:[%s3217_s4 + $0x80] sm:$0xff] }
 0x2db   : > { %v2684_v48 = vpop.permute.xlu1 %2683  ;;  %v2699_v62 = vpop.permute.xlu0 %2698 }
 0x2dc   : > { %2358 = vmatmul.mubr.msk.f32.vlgmr.msra.gmra.mrb[4].mxu0 %vm1095_vm5, %v2158_v24  ;;  %v2686_v52 = vunpack.i.h.bf16 %v2684_v48  ;;  %v2685_v53 = vunpack.i.l.bf16 %v2684_v48  ;;  %v2701_v1 = vunpack.i.h.bf16 %v2699_v62  ;;  %v2700_v2 = vunpack.i.l.bf16 %v2699_v62  ;;  %v2191_v62 = vld [vmem:[%s3219_s6] ss:$0 sm:$0xff] }
 0x2dd   : > { %2495 = vmatpush3.bf16.msra.mxu0 %v2492_v7  ;;  %2372 = vmatprep.mubr.msk.f32.mxu0 %vm1095_vm5, %v1066_v25 }
 0x2de   : > { %2497 = vmatprep.subr.bf16.mxu0 %v2496_v26  ;;  %v2524_v57 = vpack.c.bf16 %v2686_v52, %v2685_v53  ;;  %v2536_v5 = vpack.c.bf16 %v2701_v1, %v2700_v2 }
 0x2df   : > { %v2694_v58 = vpop.permute.xlu1 %2693  ;;  %v2709_v8 = vpop.permute.xlu0 %2708 }
 0x2e0   : > { %v2696_v60 = vunpack.i.h.bf16 %v2694_v58  ;;  %v2695_v61 = vunpack.i.l.bf16 %v2694_v58  ;;  %v2711_v9 = vunpack.i.h.bf16 %v2709_v8  ;;  %v2710_v10 = vunpack.i.l.bf16 %v2709_v8 }
 0x2e1   : > { %2499 = vmatpush3.bf16.msra.mxu0 %v2496_v26 }
 0x2e2   : > { %2501 = vmatprep.subr.bf16.mxu0 %v3111_v63  ;;  %v2532_v3 = vpack.c.bf16 %v2696_v60, %v2695_v61  ;;  %v2544_v15 = vpack.c.bf16 %v2711_v9, %v2710_v10  ;;  %v2188_v61 = vld [vmem:[%s3217_s4 + $0x88] sm:$0x3] }
 0x2e3   : > { %v2704_v4 = vpop.permute.xlu1 %2703  ;;  %v2719_v18 = vpop.permute.xlu0 %2718 }
 0x2e4   : > { %v2706_v6 = vunpack.i.h.bf16 %v2704_v4  ;;  %v2705_v7 = vunpack.i.l.bf16 %v2704_v4  ;;  %v2721_v19 = vunpack.i.h.bf16 %v2719_v18  ;;  %v2720_v20 = vunpack.i.l.bf16 %v2719_v18 }
 0x2e5   : > { %2503 = vmatpush3.bf16.msra.mxu0 %v3111_v63  ;;  %v2168_v63 = vld [vmem:[%s3217_s4 + $0x38] sm:$0x3] }
 0x2e6   : > { %2505 = vmatprep.subr.bf16.mxu0 %v2504_v31  ;;  %v2540_v11 = vpack.c.bf16 %v2706_v6, %v2705_v7  ;;  %v2552_v23 = vpack.c.bf16 %v2721_v19, %v2720_v20 }
 0x2e7   : > { %v2714_v12 = vpop.permute.xlu1 %2713  ;;  %v2729_v26 = vpop.permute.xlu0 %2728 }
 0x2e8   : > { %2373 = vmatmul.mubr.msk.f32.vlgmr.msra.gmra.mrb[4].mxu0 %vm1095_vm5, %v1067_v35  ;;  %v2716_v16 = vunpack.i.h.bf16 %v2714_v12  ;;  %v2715_v17 = vunpack.i.l.bf16 %v2714_v12  ;;  %v2731_v29 = vunpack.i.h.bf16 %v2729_v26  ;;  %v2730_v30 = vunpack.i.l.bf16 %v2729_v26 }
 0x2e9   : > { %2507 = vmatpush3.bf16.msra.mxu0 %v2504_v31  ;;  %2387 = vmatprep.mubr.msk.f32.mxu0 %vm1095_vm5, %v2163_v36 }
 0x2ea   : > { %2509 = vmatprep.subr.bf16.mxu0 %v2508_v39  ;;  %v2548_v21 = vpack.c.bf16 %v2716_v16, %v2715_v17  ;;  %v2560_v33 = vpack.c.bf16 %v2731_v29, %v2730_v30 }
 0x2eb   : > { %v2724_v22 = vpop.permute.xlu1 %2723  ;;  %v2739_v36 = vpop.permute.xlu0 %2738 }
 0x2ec   : > { %v2726_v24 = vunpack.i.h.bf16 %v2724_v22  ;;  %v2725_v25 = vunpack.i.l.bf16 %v2724_v22  ;;  %v2741_v37 = vunpack.i.h.bf16 %v2739_v36  ;;  %v2740_v38 = vunpack.i.l.bf16 %v2739_v36 }
 0x2ed   : > { %2511 = vmatpush3.bf16.msra.mxu0 %v2508_v39 }
 0x2ee   : > { %2513 = vmatprep.subr.bf16.mxu0 %v2512_v41  ;;  %v2556_v31 = vpack.c.bf16 %v2726_v24, %v2725_v25  ;;  %v2568_v43 = vpack.c.bf16 %v2741_v37, %v2740_v38 }
 0x2ef   : > { %v2734_v32 = vpop.permute.xlu1 %2733  ;;  %v2749_v46 = vpop.permute.xlu0 %2748 }
 0x2f0   : > { %v2736_v34 = vunpack.i.h.bf16 %v2734_v32  ;;  %v2735_v35 = vunpack.i.l.bf16 %v2734_v32  ;;  %v2750_v48 = vunpack.i.l.bf16 %v2749_v46 }
 0x2f1   : > { %2515 = vmatpush3.bf16.msra.mxu0 %v2512_v41  ;;  %v2180_v41 = vld [vmem:[%s3217_s4 + $0x68] sm:$0x3] }
 0x2f2   : > { %2517 = vmatprep.subr.bf16.mxu0 %v2516_v47  ;;  %v2564_v39 = vpack.c.bf16 %v2736_v34, %v2735_v35 }
 0x2f3   : > { %v2744_v40 = vpop.permute.xlu1 %2743  ;;  %v2759_v54 = vpop.permute.xlu0 %2758 }
 0x2f4   : > { %2388 = vmatmul.mubr.msk.f32.vlgmr.msra.gmra.mrb[4].mxu0 %vm1095_vm5, %v2164_v49  ;;  %v2746_v44 = vunpack.i.h.bf16 %v2744_v40  ;;  %v2745_v45 = vunpack.i.l.bf16 %v2744_v40  ;;  %v2760_v58 = vunpack.i.l.bf16 %v2759_v54 }
 0x2f5   : > { %2519 = vmatpush3.bf16.msra.mxu0 %v2516_v47  ;;  %2402 = vmatprep.mubr.msk.f32.mxu0 %vm1095_vm5, %v2167_v50  ;;  %v2751_v47 = vunpack.i.h.bf16 %v2749_v46 }
 0x2f6   : > { %2521 = vmatprep.subr.bf16.mxu0 %v2520_v51  ;;  %v2572_v49 = vpack.c.bf16 %v2746_v44, %v2745_v45 }
 0x2f7   : > { %v2754_v50 = vpop.permute.xlu1 %2753 }
 0x2f8   : > { %v2756_v52 = vunpack.i.h.bf16 %v2754_v50  ;;  %v2755_v53 = vunpack.i.l.bf16 %v2754_v50 }
 0x2f9   : > { %2523 = vmatpush3.bf16.msra.mxu0 %v2520_v51  ;;  %v2576_v51 = vpack.c.bf16 %v2751_v47, %v2750_v48 }
 0x2fa   : > { %2525 = vmatprep.subr.bf16.mxu0 %v2524_v57 }
 0x2fd   : > { %2527 = vmatpush3.bf16.msra.mxu0 %v2524_v57  ;;  %v2761_v57 = vunpack.i.h.bf16 %v2759_v54 }
 0x2fe   : > { %2529 = vmatprep.subr.bf16.mxu0 %v2528_v59 }
 0x2ff   : > { %v2584_v60 = vpack.c.bf16 %v2761_v57, %v2760_v58 }
 0x300   : > { %2403 = vmatmul.mubr.msk.f32.vlgmr.msra.gmra.mrb[4].mxu0 %vm1095_vm5, %v2168_v63 }
 0x301   : > { %2531 = vmatpush3.bf16.msra.mxu0 %v2528_v59  ;;  %2417 = vmatprep.mubr.msk.f32.mxu0 %vm1095_vm5, %v2171_v0  ;;  %v2580_v59 = vpack.c.bf16 %v2756_v52, %v2755_v53 }
 0x302   : > { %2533 = vmatprep.subr.bf16.mxu0 %v2532_v3 }
 0x305   : > { %2535 = vmatpush3.bf16.msra.mxu0 %v2532_v3  ;;  %v2005_v3 = vpop.permute.xlu0 %2004 }
 0x306   : > { %2537 = vmatprep.subr.bf16.mxu0 %v2536_v5 }
 0x308   : > { %v2000_v2 = vpop.permute.xlu1 %1999 }
 0x309   : > { %2539 = vmatpush3.bf16.msra.mxu0 %v2536_v5 }
 0x30a   : > { %2541 = vmatprep.subr.bf16.mxu0 %v2540_v11 }
 0x30c   : > { %2418 = vmatmul.mubr.msk.f32.vlgmr.msra.gmra.mrb[4].mxu0 %vm1095_vm5, %v2172_v13 }
 0x30d   : > { %2543 = vmatpush3.bf16.msra.mxu0 %v2540_v11  ;;  %2432 = vmatprep.mubr.msk.f32.mxu0 %vm1095_vm5, %v2175_v14 }
 0x30e   : > { %2545 = vmatprep.subr.bf16.mxu0 %v2544_v15 }
 0x311   : > { %2547 = vmatpush3.bf16.msra.mxu0 %v2544_v15 }
 0x312   : > { %2549 = vmatprep.subr.bf16.mxu0 %v2548_v21 }
 0x315   : > { %2551 = vmatpush3.bf16.msra.mxu0 %v2548_v21 }
 0x316   : > { %2553 = vmatprep.subr.bf16.mxu0 %v2552_v23 }
 0x318   : > { %2433 = vmatmul.mubr.msk.f32.vlgmr.msra.gmra.mrb[4].mxu0 %vm1095_vm5, %v2176_v27 }
 0x319   : > { %2555 = vmatpush3.bf16.msra.mxu0 %v2552_v23  ;;  %2447 = vmatprep.mubr.msk.f32.mxu0 %vm1095_vm5, %v2179_v28 }
 0x31a   : > { %2557 = vmatprep.subr.bf16.mxu0 %v2556_v31 }
 0x31d   : > { %2559 = vmatpush3.bf16.msra.mxu0 %v2556_v31 }
 0x31e   : > { %2561 = vmatprep.subr.bf16.mxu0 %v2560_v33 }
 0x321   : > { %2563 = vmatpush3.bf16.msra.mxu0 %v2560_v33 }
 0x322   : > { %2565 = vmatprep.subr.bf16.mxu0 %v2564_v39 }
 0x324   : > { %2448 = vmatmul.mubr.msk.f32.vlgmr.msra.gmra.mrb[4].mxu0 %vm1095_vm5, %v2180_v41 }
 0x325   : > { %2567 = vmatpush3.bf16.msra.mxu0 %v2564_v39  ;;  %2462 = vmatprep.mubr.msk.f32.mxu0 %vm1095_vm5, %v2183_v42 }
 0x326   : > { %2569 = vmatprep.subr.bf16.mxu0 %v2568_v43 }
 0x329   : > { %2571 = vmatpush3.bf16.msra.mxu0 %v2568_v43 }
 0x32a   : > { %2573 = vmatprep.subr.bf16.mxu0 %v2572_v49 }
 0x32d   : > { %2575 = vmatpush3.bf16.msra.mxu0 %v2572_v49 }
 0x32e   : > { %2577 = vmatprep.subr.bf16.mxu0 %v2576_v51 }
 0x330   : > { %2463 = vmatmul.mubr.msk.f32.vlgmr.msra.gmra.mrb[4].mxu0 %vm1095_vm5, %v2184_v55 }
 0x331   : > { %2579 = vmatpush3.bf16.msra.mxu0 %v2576_v51  ;;  %2477 = vmatprep.mubr.msk.f32.mxu0 %vm1095_vm5, %v2187_v56 }
 0x332   : > { %2581 = vmatprep.subr.bf16.mxu0 %v2580_v59 }
 0x335   : > { %2583 = vmatpush3.bf16.msra.mxu0 %v2580_v59 }
 0x336   : > { %2585 = vmatprep.subr.bf16.mxu0 %v2584_v60 }
 0x339   : > { %2587 = vmatpush3.bf16.msra.mxu0 %v2584_v60 }
 0x33c   : > { %2478 = vmatmul.mubr.msk.f32.vlgmr.msra.gmra.mrb[4].mxu0 %vm1095_vm5, %v2188_v61 }
 0x40f   : > { %v2479_v63 = vpop.f32.mrb[4].mxu0 }
 0x410   : > { %v1994_v0 = vmul.f32 %v2479_v63, %v2191_v62  ;;  %v1975_v1 = vpop.f32.mrb[5].mxu0 }
 0x411   : > { %v1993_v4 = vmul.f32 %v2191_v62, %v1975_v1 }
 0x412   : > { %v2008_v5 = vadd.f32 %v2005_v3, %v1994_v0 }
 0x413   : > { %v2007_v6 = vadd.f32 %v2000_v2, %v1993_v4 }
 0x414   : > { %2012 = vst.msk [vmem:[%s306_s19 + $0x8] sm:$0x3] %vm2011_vm6, %v2008_v5 }
 0x415   : > { %2010 = vst.msk [vmem:[%s306_s19] sm:$0xff] %vm2009_vm7, %v2007_v6 }
 0x416 PF: > { %s17_s26 = sadd.s32 1, %s2860_s26   ;;  %s3221_s24 = smov %s2856_s25 }
 0x417   : > { %p14_p5 = scmp.ge.s32.totalorder %s17_s26, 4   ;;  %s3222_s25 = smov %s3224_s27 }
 0x419   :  { %16 = sbr.rel (!%p14_p5) target bundleno = 2 (0x2), region = 95 }

</bundles_post_ra>
